<compile_context>
chip_gen: v6e
topology: v6e:2x2x1
jax: 0.10.0
libtpu: 0.0.40
codegen_flags: <defaults>
</compile_context>

<pallas_src>
from typing import NamedTuple

import jax
import jax.numpy as jnp
from jax.experimental import pallas as pl
from jax.experimental.pallas import tpu as pltpu


def _round_up(x, m):
    return ((x + m - 1) // m) * m


class PreparedProjection(NamedTuple):
    """Shared OutputProjection parameters, prepared once (not per forward)."""
    wt: jax.Array      # (D, V_pad): transposed, vocab-padded, MXU-operand dtype
    b2: jax.Array      # (1, V_pad): float32 bias (zero in padded columns)
    vocab_size: int    # original (unpadded) V
    tv: int            # vocab tile the padding was built for (divides V_pad)


def prepare_projection(w, b, *, tv=1024, mxu_dtype=jnp.bfloat16):
    """One-time parameter prep: transpose, vocab-pad and cast W; pad b.

    Hoisted out of the hot path: for a static projection matrix the per-call
    transpose / cast would be a full D*V read+write through XLA per forward.
    """
    v, d = w.shape
    tv = max(128, min(tv, _round_up(v, 128)))   # lane-dense multiple of 128
    v_pad = _round_up(v, tv)
    wt = w.T                                    # (D, V)
    bb = b.astype(jnp.float32)
    if v_pad != v:
        wt = jnp.pad(wt, ((0, 0), (0, v_pad - v)))
        bb = jnp.pad(bb, ((0, v_pad - v),))
    if mxu_dtype is not None:
        wt = wt.astype(mxu_dtype)
    return PreparedProjection(wt=wt, b2=bb.reshape(1, v_pad),
                              vocab_size=v, tv=tv)


def _make_kernel(n_decoders):
    """Fused ReLU-product combine + shared output projection kernel."""

    def kernel(*refs):
        x_refs = refs[:n_decoders]            # n x (tm, D) decoder-output tiles
        wt_ref = refs[n_decoders]             # (D, tv) weight tile
        b_ref = refs[n_decoders + 1]          # (1, tv) bias tile
        o_ref = refs[n_decoders + 2]          # (tm, tv) logits tile

        # ReLU-product combine over decoders (VPU, f32).  Recomputed every grid
        # step: n*tm*D VPU work is fully hidden under the tm*D*tv MXU matmul,
        # and keeping each step dependence-free lets both grid axes be
        # "parallel" (v7x megacore can shard the vocab axis too).
        comb = jnp.maximum(x_refs[0][...].astype(jnp.float32), 0.0)
        for r in x_refs[1:]:
            comb = comb * jnp.maximum(r[...].astype(jnp.float32), 0.0)

        # Shared output projection: bf16 (or f32) MXU operands, f32 accumulate.
        proj = jnp.dot(comb.astype(wt_ref.dtype), wt_ref[...],
                       preferred_element_type=jnp.float32)
        o_ref[...] = (proj + b_ref[...]).astype(o_ref.dtype)

    return kernel


def _vmem_bytes(n, tm, d, tv, w_bytes, out_bytes):
    # Double-buffered BlockSpec footprint (no scratch buffers).
    return (2 * n * tm * d * 4        # n decoder-output tiles, f32
            + 2 * d * tv * w_bytes    # weight tile
            + 2 * tv * 4              # bias tile
            + 2 * tm * tv * out_bytes)  # logits tile


def multiplicative_unprojected_forward(unprojected_outs, proj, *,
                                       tm=512, out_dtype=jnp.bfloat16,
                                       vmem_budget=48 * 1024 * 1024):
    """JAX/Pallas equivalent of MultiplicativeUnprojectedStrategy.forward.

    unprojected_outs: list of [B, S, D] arrays (same shape/dtype).
    proj: PreparedProjection from prepare_projection().
    Returns (logits [B, S, V] in out_dtype, possible_translation_tokens=None).
    """
    n = len(unprojected_outs)
    bsz, seq, d = unprojected_outs[0].shape
    m = bsz * seq
    wt, b2, vocab_size, tv = proj
    v_pad = wt.shape[1]
    assert v_pad % tv == 0

    w_bytes = wt.dtype.itemsize
    out_bytes = jnp.dtype(out_dtype).itemsize

    # tm: multiple of 16 (bf16 sublane packing of the logits tile), clamped to
    # the rounded-up number of rows for small/decode-time shapes.
    tm = max(16, min(_round_up(tm, 16), _round_up(m, 16)))

    # VMEM budget (v7x has 64 MiB physical): shrink tv before tm, since tm
    # controls how often the projection matrix is re-streamed from HBM.
    while _vmem_bytes(n, tm, d, tv, w_bytes, out_bytes) > vmem_budget:
        if tv > 256 and tv % 256 == 0:
            tv //= 2
        elif tm > 16:
            tm = max(16, ((tm // 2) + 15) // 16 * 16)
        else:
            break

    m_tiles = pl.cdiv(m, tm)
    v_tiles = v_pad // tv
    grid = (m_tiles, v_tiles)

    # Flatten (B, S) -> M rows.  No stack / pad: each decoder output is its own
    # kernel input; a ragged last M-tile is handled by Pallas' masked partial
    # blocks (out-of-bounds rows are never written back).
    xs = [u.reshape(m, d) for u in unprojected_outs]

    cost = pl.CostEstimate(
        flops=2 * m * d * v_pad + v_tiles * n * m * d,
        transcendentals=0,
        bytes_accessed=(n * m * d * xs[0].dtype.itemsize   # x: fetched once per M-tile
                        + m_tiles * d * v_pad * w_bytes    # W: re-streamed per M-tile
                        + m_tiles * v_pad * 4              # bias
                        + m * v_pad * out_bytes),          # logits writeback
    )

    vmem_limit = int(min(56 * 1024 * 1024,
                         max(32 * 1024 * 1024,
                             2 * _vmem_bytes(n, tm, d, tv, w_bytes, out_bytes))))

    out = pl.pallas_call(
        _make_kernel(n),
        out_shape=jax.ShapeDtypeStruct((m, v_pad), out_dtype),
        grid_spec=pltpu.PrefetchScalarGridSpec(
            num_scalar_prefetch=0,
            grid=grid,
            in_specs=(
                [pl.BlockSpec((tm, d), lambda i, j: (i, 0))      # decoder outs
                 for _ in range(n)]
                + [pl.BlockSpec((d, tv), lambda i, j: (0, j)),   # weight tile
                   pl.BlockSpec((1, tv), lambda i, j: (0, j))]   # bias tile
            ),
            out_specs=pl.BlockSpec((tm, tv), lambda i, j: (i, j)),
        ),
        compiler_params=pltpu.CompilerParams(
            dimension_semantics=("parallel", "parallel"),
            vmem_limit_bytes=vmem_limit),
        cost_estimate=cost,
    )(*xs, wt, b2)

    logits = out[:, :vocab_size].reshape(bsz, seq, vocab_size)
    # vocab_reduction_module is None -> possible_translation_tokens is None.
    return logits, None


def multiplicative_unprojected_apply(unprojected_outs, w, b, *,
                                     tm=512, tv=1024,
                                     mxu_dtype=jnp.bfloat16,
                                     out_dtype=jnp.bfloat16):
    """Convenience wrapper matching the module signature (prepare + forward)."""
    proj = prepare_projection(w, b, tv=tv, mxu_dtype=mxu_dtype)
    return multiplicative_unprojected_forward(unprojected_outs, proj,
                                              tm=tm, out_dtype=out_dtype)


def _reference_forward(unprojected_outs, w, b):
    combined = jnp.prod(
        jnp.maximum(jnp.stack(unprojected_outs, axis=0), 0.0), axis=0)
    return jnp.einsum("bsd,vd->bsv", combined, w) + b[None, None, :]


if __name__ == "__main__":
    key = jax.random.PRNGKey(0)

    # Small shapes consistent with the module: 2 decoders, batch=2, seq=8,
    # out_embed_dim=32, vocab_size=256.
    n_decoders = 2
    batch, seq, hidden, vocab = 2, 8, 32, 256

    keys = jax.random.split(key, n_decoders + 1)
    unprojected_outs = [
        jax.random.normal(keys[i], (batch, seq, hidden), dtype=jnp.float32)
        for i in range(n_decoders)
    ]
    # OutputProjection init: W ~ U(-0.1, 0.1), b = 0.
    w = jax.random.uniform(keys[-1], (vocab, hidden), dtype=jnp.float32,
                           minval=-0.1, maxval=0.1)
    b = jnp.zeros((vocab,), dtype=jnp.float32)

    ref = _reference_forward(unprojected_outs, w, b)

    # 1) Default fast path: bf16 MXU operands (f32 accumulate) + bf16 logits.
    logits, possible_translation_tokens = multiplicative_unprojected_apply(
        unprojected_outs, w, b)
    logits = jax.block_until_ready(logits)
    assert logits.shape == (batch, seq, vocab)
    assert logits.dtype == jnp.bfloat16
    assert possible_translation_tokens is None
    assert jnp.allclose(logits.astype(jnp.float32), ref, atol=2e-2, rtol=2e-2)

    # 2) Full-f32 path (mxu_dtype=None, f32 logits): tight reference check.
    logits_f32, _ = multiplicative_unprojected_apply(
        unprojected_outs, w, b, mxu_dtype=None, out_dtype=jnp.float32)
    logits_f32 = jax.block_until_ready(logits_f32)
    assert jnp.allclose(logits_f32, ref, atol=1e-4, rtol=1e-4)

    # 3) Ragged shapes: M not a multiple of the tile (masked partial blocks,
    #    no wrapper-side padding of the activations) and vocab not a multiple
    #    of 128 (padded once at prepare time, sliced off on return).
    b3, s3, v3 = 3, 5, 200
    keys3 = jax.random.split(jax.random.PRNGKey(1), n_decoders + 1)
    outs3 = [jax.random.normal(keys3[i], (b3, s3, hidden), dtype=jnp.float32)
             for i in range(n_decoders)]
    w3 = jax.random.uniform(keys3[-1], (v3, hidden), dtype=jnp.float32,
                            minval=-0.1, maxval=0.1)
    bias3 = jnp.zeros((v3,), dtype=jnp.float32)
    logits3, _ = multiplicative_unprojected_apply(
        outs3, w3, bias3, mxu_dtype=None, out_dtype=jnp.float32)
    logits3 = jax.block_until_ready(logits3)
    ref3 = _reference_forward(outs3, w3, bias3)
    assert logits3.shape == (b3, s3, v3)
    assert jnp.allclose(logits3, ref3, atol=1e-4, rtol=1e-4)

    print("KERNEL_OK")
</pallas_src>

<mosaic_0001>
module attributes {stable_mosaic.version = 11 : i64} {
  func.func @kernel(%arg0: i32, %arg1: i32, %arg2: memref<16x32xf32, #tpu.memory_space<vmem>>, %arg3: memref<16x32xf32, #tpu.memory_space<vmem>>, %arg4: memref<32x256xbf16, #tpu.memory_space<vmem>>, %arg5: memref<1x256xf32, #tpu.memory_space<vmem>>, %arg6: memref<16x256xbf16, #tpu.memory_space<vmem>>) attributes {dimension_semantics = [#tpu.dimension_semantics<parallel>, #tpu.dimension_semantics<parallel>], iteration_bounds = array<i64: 1, 1>, scalar_prefetch = 0 : i64, scratch_operands = 0 : i64, tpu.core_type = #tpu.core_type<tc>, window_params = [{transform_indices = @transform_0, window_bounds = array<i64: 16, 32>}, {transform_indices = @transform_1, window_bounds = array<i64: 16, 32>}, {transform_indices = @transform_2, window_bounds = array<i64: 32, 256>}, {transform_indices = @transform_3, window_bounds = array<i64: 1, 256>}, {transform_indices = @transform_4, window_bounds = array<i64: 16, 256>}]} {
    %c0 = arith.constant 0 : index
    %c0_0 = arith.constant 0 : index
    %0 = vector.load %arg2[%c0, %c0_0] : memref<16x32xf32, #tpu.memory_space<vmem>>, vector<16x32xf32>
    %cst = arith.constant 0.000000e+00 : f32
    %1 = vector.broadcast %cst : f32 to vector<16x32xf32>
    %2 = arith.maximumf %0, %1 : vector<16x32xf32>
    %c0_1 = arith.constant 0 : index
    %c0_2 = arith.constant 0 : index
    %3 = vector.load %arg3[%c0_1, %c0_2] : memref<16x32xf32, #tpu.memory_space<vmem>>, vector<16x32xf32>
    %cst_3 = arith.constant 0.000000e+00 : f32
    %4 = vector.broadcast %cst_3 : f32 to vector<16x32xf32>
    %5 = arith.maximumf %3, %4 : vector<16x32xf32>
    %6 = arith.mulf %2, %5 : vector<16x32xf32>
    %7 = arith.truncf %6 : vector<16x32xf32> to vector<16x32xbf16>
    %c0_4 = arith.constant 0 : index
    %c0_5 = arith.constant 0 : index
    %8 = vector.load %arg4[%c0_4, %c0_5] : memref<32x256xbf16, #tpu.memory_space<vmem>>, vector<32x256xbf16>
    %cst_6 = arith.constant dense<0.000000e+00> : vector<16x256xf32>
    %9 = tpu.matmul %7, %8, %cst_6 {dimension_numbers = #tpu.dot_dimension_numbers<[1], [0], [0], [1], [0, 0, 1, 1], [], []>} : vector<16x32xbf16>, vector<32x256xbf16>, vector<16x256xf32> -> vector<16x256xf32>
    %c0_7 = arith.constant 0 : index
    %c0_8 = arith.constant 0 : index
    %10 = vector.load %arg5[%c0_7, %c0_8] : memref<1x256xf32, #tpu.memory_space<vmem>>, vector<1x256xf32>
    %11 = vector.broadcast %10 : vector<1x256xf32> to vector<16x256xf32>
    %12 = arith.addf %9, %11 : vector<16x256xf32>
    %13 = arith.truncf %12 : vector<16x256xf32> to vector<16x256xbf16>
    %c0_9 = arith.constant 0 : index
    %c0_10 = arith.constant 0 : index
    %14 = vector.load %arg6[%c0_9, %c0_10] : memref<16x256xbf16, #tpu.memory_space<vmem>>, vector<16x256xbf16>
    tpu.vector_store %arg6[%c0_9, %c0_10], %13 {strides = array<i32>} : memref<16x256xbf16, #tpu.memory_space<vmem>>, vector<16x256xbf16>,
    return
  }
  func.func @transform_0(%arg0: i32, %arg1: i32) -> (i32, i32) {
    %c0_i32 = arith.constant 0 : i32
    %c0_i32_0 = arith.constant 0 : i32
    return %arg0, %c0_i32 : i32, i32
  }
  func.func @transform_1(%arg0: i32, %arg1: i32) -> (i32, i32) {
    %c0_i32 = arith.constant 0 : i32
    %c0_i32_0 = arith.constant 0 : i32
    return %arg0, %c0_i32 : i32, i32
  }
  func.func @transform_2(%arg0: i32, %arg1: i32) -> (i32, i32) {
    %c0_i32 = arith.constant 0 : i32
    %c0_i32_0 = arith.constant 0 : i32
    return %c0_i32, %arg1 : i32, i32
  }
  func.func @transform_3(%arg0: i32, %arg1: i32) -> (i32, i32) {
    %c0_i32 = arith.constant 0 : i32
    %c0_i32_0 = arith.constant 0 : i32
    return %c0_i32, %arg1 : i32, i32
  }
  func.func @transform_4(%arg0: i32, %arg1: i32) -> (i32, i32) {
    %c0_i32 = arith.constant 0 : i32
    return %arg0, %arg1 : i32, i32
  }
}

</mosaic_0001>

<bundles_post_ra>
// kernel: tpu_custom_call.1
= control target key start
LH: loop header
LB: loop body
LE: loop exit
PB: predicated region body
PF: predicated region fallthrough
CT: control target
= control target key end

     0   :  { %9 = vsyncpa [#allocation3], 0  ;;  %s353_s0 = inlined_call_operand.hbm [shape: f32[16,32], index: 0, kind: input, shape index: {}]   ;;  %s354_s1 = inlined_call_operand.hbm [shape: f32[16,32], index: 1, kind: input, shape index: {}]   ;;  %s355_s2 = inlined_call_operand.hbm [shape: bf16[32,256], index: 2, kind: input, shape index: {}]   ;;  %s356_s3 = inlined_call_operand.vmem [shape: f32[1,256], index: 3, kind: input, shape index: {}]   ;;  %s357_s4 = inlined_call_operand.hbm [shape: bf16[16,256], index: 4, kind: output, shape index: {}]  }
   0x1   :  { %10 = vsyncpa [#allocation6], 0 }
   0x2   :  { %11 = vsyncpa [#allocation4], 0  ;;  %s294_s15 = smov [#allocation5]   ;;  %s295_s17 = smov [#allocation2]  }
   0x3   :  { %s29_s16 = sshll.u32 %s294_s15, 4  ;;  %s17_s18 = sshll.u32 %s295_s17, 4  ;;  %s30_s16 = int_to_ptr.vmem [resolvable:$true] %s29_s16  ;;  %s18_s18 = int_to_ptr.vmem [resolvable:$true] %s17_s18 }
   0x4   :  { %s216_s19 = scalar_lea.vmem %s30_s16, 256  ;;  %p221_p1 = scmp.lt.s32.totalorder %s30_s16, %s30_s16 }
   0x5   :  { %p217_p0 = scmp.ne.s32.totalorder %s30_s16, %s216_s19  ;;  %p222_p2 = scmp.lt.s32.totalorder %s216_s19, %s216_s19 }
   0x7   :  { %p223_p3 = por %p222_p2, %p221_p1 }
   0x9   :  { %p224_p4 = pnand %p223_p3, %p217_p0 }
   0xb   :  { %227 = shalt.err (!%p224_p4)
}
   0xc   :  { %s296_s20 = smov 128   ;;  %s297_s21 = smov 8  }
   0xd   :  { %35 = dma.hbm_to_vmem [thread:$0]  %s354_s1, 256, %s30_s16, [#allocation6], %s296_s20, %s296_s20, %s297_s21  }
   0xe   :  { %s236_s24 = scalar_lea.vmem %s18_s18, 256  ;;  %p241_p6 = scmp.lt.s32.totalorder %s18_s18, %s18_s18 }
   0xf   :  { %p237_p5 = scmp.ne.s32.totalorder %s18_s18, %s236_s24  ;;  %p242_p7 = scmp.lt.s32.totalorder %s236_s24, %s236_s24 }
  0x11   :  { %p243_p8 = por %p242_p7, %p241_p6 }
  0x13   :  { %p244_p9 = pnand %p243_p8, %p237_p5 }
  0x15   :  { %247 = shalt.err (!%p244_p9)
}
  0x16   :  { %23 = dma.hbm_to_vmem [thread:$0]  %s353_s0, 256, %s18_s18, [#allocation3], %s296_s20, %s296_s20, %s297_s21  }
  0x17   :  { %s298_s27 = smov [#allocation7]  }
  0x18   :  { %s41_s28 = sshll.u32 %s298_s27, 4  ;;  %s42_s28 = int_to_ptr.vmem [resolvable:$true] %s41_s28 }
  0x19   :  { %s256_s29 = scalar_lea.vmem %s42_s28, 512  ;;  %p261_p11 = scmp.lt.s32.totalorder %s42_s28, %s42_s28 }
  0x1a   :  { %p257_p10 = scmp.ne.s32.totalorder %s42_s28, %s256_s29  ;;  %p262_p12 = scmp.lt.s32.totalorder %s256_s29, %s256_s29 }
  0x1c   :  { %p263_p13 = por %p262_p12, %p261_p11 }
  0x1e   :  { %p264_p0 = pnand %p263_p13, %p257_p10 }
  0x20   :  { %267 = shalt.err (!%p264_p0)
}
  0x21   :  { %47 = dma.hbm_to_vmem [thread:$0]  %s355_s2, 512, %s42_s28, [#allocation6], %s296_s20, %s296_s20, %s297_s21  }
  0x22   :  { %288 = dma.done.wait [#allocation3], 256  }
  0x23   :  { %289 = vsyncadd [#allocation3], 4294967040 }
  0x24   :  { %290 = dma.done.wait [#allocation6], 768  }
  0x25   :  { %291 = vsyncadd [#allocation6], 4294966528  ;;  %v299_v0 = vmov 0   ;;  %v202_v1 = vld [vmem:[#allocation7 + $0x14] ss:$8 sps:$4 sm:$0xff]   ;;  %v60_v5 = vld [vmem:[#allocation2] sm:$0xff]  ;;  %v77_v16 = vlaneseq }
  0x26   :  { %143 = vmatprep.mubr.bf16.mxu0 %v299_v0  ;;  %v204_v2 = vld [vmem:[#allocation7 + $0x10] ss:$8 sps:$4 sm:$0xff]   ;;  %123 = vmatprep.subr.bf16.mxu0 %v202_v1  ;;  %v205_v3 = vld [vmem:[#allocation7 + $0x4] ss:$8 sps:$4 sm:$0xff]   ;;  %v207_v4 = vld [vmem:[#allocation7] ss:$8 sps:$4 sm:$0xff]  }
  0x27   :  { %124 = vmatpush1.bf16.msra.mxu0 %v204_v2  ;;  %v61_v6 = vld [vmem:[#allocation2 + $0x8] sm:$0xff]  ;;  %v62_v7 = vmax.f32 %v60_v5, 0.0  ;;  %v64_v8 = vld [vmem:[#allocation5] sm:$0xff]  ;;  %v65_v9 = vld [vmem:[#allocation5 + $0x8] sm:$0xff]  ;;  %vm107_vm0 = vcmask 261120   ;;  %v78_v17 = vshrl.u32 %v77_v16, 7 }
  0x28   :  { %125 = vmatprep.subr.bf16.mxu0 %v205_v3  ;;  %v63_v10 = vmax.f32 %v61_v6, 0.0  ;;  %v66_v11 = vmax.f32 %v64_v8, 0.0  ;;  %v67_v12 = vmax.f32 %v65_v9, 0.0  ;;  %v75_v20 = vld [vmem:[%s356_s3] sm:$0x3]  ;;  %s300_s5 = smov [#allocation8]  }
  0x29   :  { %v79_v18 = vsub.s32 0, %v78_v17  ;;  %v83_v19 = vsub.s32 1, %v78_v17  ;;  %s173_s6 = sshll.u32 %s300_s5, 4  ;;  %s174_s6 = int_to_ptr.vmem [resolvable:$true] %s173_s6 }
  0x2a   :  { %v68_v13 = vmul.f32 %v66_v11, %v62_v7  ;;  %v69_v14 = vmul.f32 %v67_v12, %v63_v10  ;;  %s268_s7 = scalar_lea.vmem %s174_s6, 256  ;;  %p273_p2 = scmp.lt.s32.totalorder %s174_s6, %s174_s6 }
  0x2b   :  { %126 = vmatpush1.bf16.msra.mxu0 %v207_v4  ;;  %v80_v21 = vrot.slane %v75_v20, %v79_v18  ;;  %v84_v22 = vrot.slane %v75_v20, %v83_v19  ;;  %p269_p1 = scmp.ne.s32.totalorder %s174_s6, %s268_s7  ;;  %p274_p3 = scmp.lt.s32.totalorder %s268_s7, %s268_s7 }
  0x2c   :  { %v70_v15 = vpack.c.bf16 %v69_v14, %v68_v13 }
  0x2d   :  { %p275_p4 = por %p274_p3, %p273_p2 }
  0x2e   :  { %190 = vmatmul.mubr.msk.bf16.vlgmr.msra.gmra.mxu0 %vm107_vm0, %v70_v15 }
  0x2f   :  { %p276_p5 = pnand %p275_p4, %p269_p1 }
  0xee   :  { %v145_v23 = vpop.f32.mrf.mxu0 }
  0xef   :  { %v146_v25 = vadd.f32 %v145_v23, %v80_v21 }
  0xf0   :  { %v147_v24 = vpop.f32.mrf.mxu0 }
  0xf1   :  { %v148_v26 = vadd.f32 %v147_v24, %v84_v22 }
  0xf2   :  { %v149_v27 = vpop.f32.mrf.mxu0 }
  0xf3   :  { %v193_v28 = vpack.c.bf16 %v148_v26, %v146_v25  ;;  %v150_v30 = vadd.f32 %v149_v27, %v80_v21 }
  0xf4   :  { %v151_v29 = vpop.f32.mrf.mxu0 }
  0xf5   :  { %166 = vst [vmem:[#allocation8] sm:$0xff] %v193_v28  ;;  %v152_v31 = vadd.f32 %v151_v29, %v84_v22 }
  0xf7   :  { %v194_v32 = vpack.c.bf16 %v152_v31, %v150_v30 }
  0xf9   :  { %167 = vst [vmem:[#allocation8 + $0x8] sm:$0xff] %v194_v32 }
  0xfa   :  { %279 = shalt.err (!%p276_p5)
}
  0xfb   :  { %179 = dma.vmem_to_hbm [thread:$0]  %s174_s6, 256, %s357_s4, [#allocation4], %s296_s20, %s296_s20, %s297_s21  }
  0xfc   :  { %292 = dma.done.wait [#allocation4], 256  }
  0xfd   :  { %293 = vsyncadd [#allocation4], 4294967040 }
  0xfe   :  { %183 = vsyncpa [#allocation3], 1 }
  0xff   :  { %184 = vsyncpa [#allocation6], 1 }
 0x100   :  { %185 = vsyncpa [#allocation4], 1 }

</bundles_post_ra>
